<compile_context>
chip_gen: v5e
topology: v5e:2x2
jax: 0.10.0
libtpu: 0.0.40
codegen_flags: <defaults>
</compile_context>

<pallas_src>
from functools import partial

import jax
import jax.numpy as jnp
from jax.experimental import pallas as pl
from jax.experimental.pallas import tpu as pltpu

# Teacher weights as Python constants -> baked into the kernel (zero HBM traffic).
_W1 = ((0.6, -0.5, -0.2, 0.1),      # weights for input feature 0
       (0.5,  0.5, -0.6, -0.6))     # weights for input feature 1
_W2 = (1.0, -1.0, 1.0, -1.0)        # output weights for the 4 hidden units (+/-1)

# Pre-halved W1 so sigmoid(z) = 0.5*tanh(z/2)+0.5 needs no extra multiply for z/2.
_HW1 = tuple(tuple(0.5 * w for w in row) for row in _W1)

D_IN = 2
HID = 4

_LANE = 128
_MIN_TILE = 8 * _LANE          # 1024: smallest batch tile (8 sublanes x 128 lanes)
_MAX_TILE = 262144             # ~256K samples -> 3 MiB in+out, 6 MiB double-buffered
_MIN_BIG_TILE = 65536          # never shrink big-batch tiles below this (step overhead)


def _round_up(v, m):
    return ((v + m - 1) // m) * m


def _pick_tile(n, max_tile):
    """Batch tile (in samples); always a multiple of 1024 (8x128)."""
    max_tile = max(_MIN_TILE, _round_up(max_tile, _MIN_TILE))
    if n <= max_tile:
        return _round_up(max(n, 1), _MIN_TILE)
    # Large batch: want >= 4 grid steps so v7x's two TensorCores both stay busy,
    # while keeping tiles large enough to amortize the ~0.35us per-step overhead.
    steps = max(4, -(-n // max_tile))
    tile = _round_up(-(-n // steps), _MIN_TILE)
    return max(min(tile, max_tile), min(_MIN_BIG_TILE, max_tile))


def teacher_kernel(xt_ref, y_ref):
    # xt_ref: (2, R, 128) block of x^T (sublane+lane dense); y_ref: (R, 128).
    x0 = xt_ref[0]                       # (R, 128) -- input feature 0
    x1 = xt_ref[1]                       # (R, 128) -- input feature 1

    def t(j):
        # tanh(z_j / 2) with the /2 pre-folded into the constants (EUP op).
        return jnp.tanh(_HW1[0][j] * x0 + _HW1[1][j] * x1)

    # sigmoid(z) = 0.5*tanh(z/2)+0.5 and W2 = (+1,-1,+1,-1) sums to zero, so the
    # four +0.5 offsets cancel exactly: y = 0.5*(t0 - t1 + t2 - t3).
    y_ref[...] = 0.5 * (t(0) - t(1) + t(2) - t(3))


@partial(jax.jit, static_argnames=("max_tile",))
def teacher_forward(x, *, max_tile=_MAX_TILE):
    """x: (N, D_in=2) float -> (N, 1) float32, matching TeacherNetwork.forward."""
    n, d_in = x.shape
    assert d_in == D_IN

    tile = _pick_tile(n, max_tile)
    n_pad = _round_up(n, tile)
    rows_total = n_pad // _LANE
    rows = tile // _LANE

    # One fused XLA pass: cast + transpose + pad; the reshape to the dense
    # (2, n_pad//128, 128) sublane/lane layout is free (contiguous).
    xt = jnp.pad(x.astype(jnp.float32).T, ((0, 0), (0, n_pad - n)))
    xt = xt.reshape(D_IN, rows_total, _LANE)

    y = pl.pallas_call(
        teacher_kernel,
        out_shape=jax.ShapeDtypeStruct((rows_total, _LANE), jnp.float32),
        grid_spec=pltpu.PrefetchScalarGridSpec(
            num_scalar_prefetch=0,
            grid=(n_pad // tile,),
            in_specs=[pl.BlockSpec((D_IN, rows, _LANE), lambda i: (0, i, 0))],
            out_specs=pl.BlockSpec((rows, _LANE), lambda i: (i, 0)),
        ),
        compiler_params=pltpu.CompilerParams(
            dimension_semantics=("parallel",),
            vmem_limit_bytes=32 * 1024 * 1024),
    )(xt)

    # Padded batch columns hold finite garbage and are sliced away (never reduced over).
    return y.reshape(n_pad)[:n].reshape(n, 1)


def teacher_reference(x):
    """Pure-JAX reference for correctness checking."""
    w1 = jnp.array(_W1, dtype=jnp.float32)                  # (2, 4)
    w2 = jnp.array(_W2, dtype=jnp.float32).reshape(HID, 1)  # (4, 1)
    h = jax.nn.sigmoid(x.astype(jnp.float32) @ w1)
    return h @ w2


if __name__ == "__main__":
    # Small shapes consistent with the module: rows of D_in=2 features.
    x = jax.random.normal(jax.random.PRNGKey(0), (8, D_IN), dtype=jnp.float32)
    y = teacher_forward(x)
    jax.block_until_ready(y)
    assert y.shape == (8, 1), y.shape
    assert jnp.allclose(y, teacher_reference(x), atol=1e-5, rtol=1e-5)

    # Non-lane-aligned batch to exercise the padding path.
    x2 = jax.random.normal(jax.random.PRNGKey(1), (200, D_IN), dtype=jnp.float32)
    y2 = teacher_forward(x2)
    jax.block_until_ready(y2)
    assert y2.shape == (200, 1), y2.shape
    assert jnp.allclose(y2, teacher_reference(x2), atol=1e-5, rtol=1e-5)

    # Exercise the multi-step (pipelined, "parallel") grid path with small data by
    # capping the tile size.
    x3 = jax.random.normal(jax.random.PRNGKey(2), (5000, D_IN), dtype=jnp.float32)
    y3 = teacher_forward(x3, max_tile=1024)
    jax.block_until_ready(y3)
    assert y3.shape == (5000, 1), y3.shape
    assert jnp.allclose(y3, teacher_reference(x3), atol=1e-5, rtol=1e-5)

    print("KERNEL_OK")
</pallas_src>

<mosaic_0001>
module attributes {stable_mosaic.version = 11 : i64} {
  func.func @teacher_kernel(%arg0: i32, %arg1: memref<2x8x128xf32, #tpu.memory_space<vmem>>, %arg2: memref<8x128xf32, #tpu.memory_space<vmem>>) attributes {dimension_semantics = [#tpu.dimension_semantics<parallel>], iteration_bounds = array<i64: 1>, scalar_prefetch = 0 : i64, scratch_operands = 0 : i64, tpu.core_type = #tpu.core_type<tc>, window_params = [{transform_indices = @transform_0, window_bounds = array<i64: 2, 8, 128>}, {transform_indices = @transform_1, window_bounds = array<i64: 8, 128>}]} {
    %c0 = arith.constant 0 : index
    %c0_0 = arith.constant 0 : index
    %c0_1 = arith.constant 0 : index
    %0 = vector.load %arg1[%c0, %c0_0, %c0_1] : memref<2x8x128xf32, #tpu.memory_space<vmem>>, vector<1x8x128xf32>
    %1 = vector.shape_cast %0 : vector<1x8x128xf32> to vector<8x128xf32>
    %c1 = arith.constant 1 : index
    %c0_2 = arith.constant 0 : index
    %c0_3 = arith.constant 0 : index
    %2 = vector.load %arg1[%c1, %c0_2, %c0_3] : memref<2x8x128xf32, #tpu.memory_space<vmem>>, vector<1x8x128xf32>
    %3 = vector.shape_cast %2 : vector<1x8x128xf32> to vector<8x128xf32>
    %cst = arith.constant 3.000000e-01 : f32
    %4 = vector.broadcast %cst : f32 to vector<8x128xf32>
    %5 = arith.mulf %4, %1 : vector<8x128xf32>
    %cst_4 = arith.constant 2.500000e-01 : f32
    %6 = vector.broadcast %cst_4 : f32 to vector<8x128xf32>
    %7 = arith.mulf %6, %3 : vector<8x128xf32>
    %8 = arith.addf %5, %7 : vector<8x128xf32>
    %9 = math.tanh %8 : vector<8x128xf32>
    %cst_5 = arith.constant -2.500000e-01 : f32
    %10 = vector.broadcast %cst_5 : f32 to vector<8x128xf32>
    %11 = arith.mulf %10, %1 : vector<8x128xf32>
    %cst_6 = arith.constant 2.500000e-01 : f32
    %12 = vector.broadcast %cst_6 : f32 to vector<8x128xf32>
    %13 = arith.mulf %12, %3 : vector<8x128xf32>
    %14 = arith.addf %11, %13 : vector<8x128xf32>
    %15 = math.tanh %14 : vector<8x128xf32>
    %16 = arith.subf %9, %15 : vector<8x128xf32>
    %cst_7 = arith.constant -1.000000e-01 : f32
    %17 = vector.broadcast %cst_7 : f32 to vector<8x128xf32>
    %18 = arith.mulf %17, %1 : vector<8x128xf32>
    %cst_8 = arith.constant -3.000000e-01 : f32
    %19 = vector.broadcast %cst_8 : f32 to vector<8x128xf32>
    %20 = arith.mulf %19, %3 : vector<8x128xf32>
    %21 = arith.addf %18, %20 : vector<8x128xf32>
    %22 = math.tanh %21 : vector<8x128xf32>
    %23 = arith.addf %16, %22 : vector<8x128xf32>
    %cst_9 = arith.constant 5.000000e-02 : f32
    %24 = vector.broadcast %cst_9 : f32 to vector<8x128xf32>
    %25 = arith.mulf %24, %1 : vector<8x128xf32>
    %cst_10 = arith.constant -3.000000e-01 : f32
    %26 = vector.broadcast %cst_10 : f32 to vector<8x128xf32>
    %27 = arith.mulf %26, %3 : vector<8x128xf32>
    %28 = arith.addf %25, %27 : vector<8x128xf32>
    %29 = math.tanh %28 : vector<8x128xf32>
    %30 = arith.subf %23, %29 : vector<8x128xf32>
    %cst_11 = arith.constant 5.000000e-01 : f32
    %31 = vector.broadcast %cst_11 : f32 to vector<8x128xf32>
    %32 = arith.mulf %31, %30 : vector<8x128xf32>
    %c0_12 = arith.constant 0 : index
    %c0_13 = arith.constant 0 : index
    %33 = vector.load %arg2[%c0_12, %c0_13] : memref<8x128xf32, #tpu.memory_space<vmem>>, vector<8x128xf32>
    tpu.vector_store %arg2[%c0_12, %c0_13], %32 {strides = array<i32>} : memref<8x128xf32, #tpu.memory_space<vmem>>, vector<8x128xf32>,
    return
  }
  func.func @transform_0(%arg0: i32) -> (i32, i32, i32) {
    %c0_i32 = arith.constant 0 : i32
    %c0_i32_0 = arith.constant 0 : i32
    %c0_i32_1 = arith.constant 0 : i32
    return %c0_i32, %arg0, %c0_i32_0 : i32, i32, i32
  }
  func.func @transform_1(%arg0: i32) -> (i32, i32) {
    %c0_i32 = arith.constant 0 : i32
    %c0_i32_0 = arith.constant 0 : i32
    return %arg0, %c0_i32 : i32, i32
  }
}

</mosaic_0001>

<bundles_post_ra>
// kernel: teacher_forward.1
= control target key start
LH: loop header
LB: loop body
LE: loop exit
PB: predicated region body
PF: predicated region fallthrough
CT: control target
= control target key end

     0   :  { %s62_s0 = inlined_call_operand.vmem [shape: f32[2,8,128], index: 0, kind: input, shape index: {}]   ;;  %s63_s1 = inlined_call_operand.vmem [shape: f32[8,128], index: 1, kind: output, shape index: {}]  }
   0x1   :  { %v8_v0 = vld [vmem:[%s62_s0] sm:$0xff]  ;;  %v34_v1 = vld [vmem:[%s62_s0 + $0x8] sm:$0xff] }
   0x2   :  { %v11_v2 = vmul.f32 0.3, %v8_v0  ;;  %v12_v3 = vmul.f32 0.25, %v34_v1  ;;  %v15_v4 = vmul.f32 -0.25, %v8_v0  ;;  %v19_v5 = vmul.f32 -0.1, %v8_v0 }
   0x3   :  { %v20_v6 = vmul.f32 -0.3, %v34_v1  ;;  %v24_v7 = vmul.f32 0.05, %v8_v0 }
   0x4   :  { %v13_v8 = vadd.f32 %v12_v3, %v11_v2  ;;  %v16_v9 = vadd.f32 %v15_v4, %v12_v3 }
   0x5   :  { %v21_v10 = vadd.f32 %v20_v6, %v19_v5  ;;  %v25_v11 = vadd.f32 %v24_v7, %v20_v6 }
   0x6   :  { %35 = vtanh.f32 %v13_v8 }
   0x7   :  { %37 = vtanh.f32 %v16_v9 }
   0x8   :  { %39 = vtanh.f32 %v21_v10 }
   0x9   :  { %41 = vtanh.f32 %v25_v11 }
   0xc   :  { %v36_v12 = vpop.eup %35 }
   0xd   :  { %v38_v13 = vpop.eup %37 }
   0xe   :  { %v40_v14 = vpop.eup %39  ;;  %v18_v15 = vsub.f32 %v36_v12, %v38_v13 }
   0xf   :  { %v42_v16 = vpop.eup %41 }
  0x10   :  { %v23_v17 = vadd.f32 %v40_v14, %v18_v15 }
  0x12   :  { %v27_v18 = vsub.f32 %v23_v17, %v42_v16 }
  0x14   :  { %v28_v19 = vmul.f32 0.5, %v27_v18 }
  0x16   :  { %29 = vst [vmem:[%s63_s1] sm:$0xff] %v28_v19 }

</bundles_post_ra>
